<compile_context>
chip_gen: v7x
topology: tpu7x:2x2x1
jax: 0.10.0
libtpu: 0.0.40
codegen_flags: <defaults>
</compile_context>

<pallas_src>
import jax
import jax.numpy as jnp
from jax.experimental import pallas as pl
from jax.experimental.pallas import tpu as pltpu


def _round_up(n, m):
    return ((n + m - 1) // m) * m


def _aconc_kernel(x_ref, prm_ref, o_ref):
    # x block:   (rb, lb)  rows = flattened (N*C1) -> sublanes,
    #                      lanes = flattened (H*W) -> lanes (lane-dense store).
    # prm block: (rb, 3) folded per-row params, broadcast across lanes by VPU:
    #   col 0: a  = 0.5 * beta * (p1 - p2)
    #   col 1: hd = 0.5 * (p1 - p2)
    #   col 2: c  = 0.5 * (p1 + p2)
    # out = x * (hd * tanh(a*x) + c)  ==  dpx*sigmoid(beta*dpx) + p2*x
    x = x_ref[...].astype(jnp.float32)
    a = prm_ref[:, 0:1]
    hd = prm_ref[:, 1:2]
    c = prm_ref[:, 2:3]
    t = jnp.tanh(a * x)  # single EUP transcendental (free slot; no divide)
    o_ref[...] = (x * (hd * t + c)).astype(o_ref.dtype)


def aconc(x, p1, p2, beta, *, row_tile=256, target_tile_bytes=4 << 20):
    """ACON-C forward.

    x:    (N, C1, H, W)
    p1, p2, beta: PyTorch nn.Parameter layout (1, C1, 1, 1) (any shape with C1
                  elements is accepted).
    Returns (N, C1, H, W) with x.dtype.
    """
    N, C1, H, W = x.shape
    R, HW = N * C1, H * W

    # Flatten: batch*channel -> sublane axis, spatial -> lane axis.
    xr = x.reshape(R, HW)

    # Fold per-channel params once in the wrapper into a single (R, 3) array.
    f32 = jnp.float32
    p1c = jnp.reshape(p1, (C1,)).astype(f32)
    p2c = jnp.reshape(p2, (C1,)).astype(f32)
    bc = jnp.reshape(beta, (C1,)).astype(f32)
    a_c = 0.5 * bc * (p1c - p2c)
    hd_c = 0.5 * (p1c - p2c)
    c_c = 0.5 * (p1c + p2c)
    prm = jnp.broadcast_to(
        jnp.stack([a_c, hd_c, c_c], axis=-1)[None], (N, C1, 3)
    ).reshape(R, 3)

    # Byte-aware tile sizing.  Sublane packing depends on dtype (f32->8,
    # bf16->16, int8/fp8->32); lane_tile keeps a constant ~4 MiB x tile.
    itemsize = jnp.dtype(x.dtype).itemsize
    sub_mult = max(8, 32 // itemsize)
    row_tile = _round_up(max(row_tile, sub_mult), sub_mult)
    lane_tile = max(128, (target_tile_bytes // (row_tile * itemsize)) // 128 * 128)

    # Fixed (8,128)-multiple blocks; clamp to full extent only when the array
    # is smaller than one packed vreg row.  Ragged last blocks are handled by
    # the cdiv grid + masked stores, so VMEM stays bounded for all shapes.
    rb = min(row_tile, _round_up(R, sub_mult)) if R >= sub_mult else R
    lb = min(lane_tile, _round_up(HW, 128)) if HW >= 128 else HW

    # v7x has 2 TensorCores: make sure small inputs still give the parallel
    # grid at least 2 steps so both cores get work.
    if pl.cdiv(R, rb) == 1 and pl.cdiv(HW, lb) == 1:
        if lb >= 256:
            lb = _round_up(pl.cdiv(lb, 2), 128)
        elif rb >= 2 * sub_mult:
            rb = _round_up(pl.cdiv(rb, 2), sub_mult)

    grid = (pl.cdiv(R, rb), pl.cdiv(HW, lb))  # lane axis innermost: the
    # (i, 0) param block index is unchanged across j, so its DMA is skipped.

    cost = pl.CostEstimate(
        flops=6 * R * HW,
        transcendentals=R * HW,
        bytes_accessed=2 * R * HW * itemsize + R * 3 * 4,
    )

    out = pl.pallas_call(
        _aconc_kernel,
        out_shape=jax.ShapeDtypeStruct((R, HW), x.dtype),
        grid=grid,
        in_specs=[
            pl.BlockSpec((rb, lb), lambda i, j: (i, j)),  # x
            pl.BlockSpec((rb, 3), lambda i, j: (i, 0)),   # folded params
        ],
        out_specs=pl.BlockSpec((rb, lb), lambda i, j: (i, j)),
        compiler_params=pltpu.CompilerParams(
            dimension_semantics=("parallel", "parallel"),
            vmem_limit_bytes=48 << 20,  # fits in+out double buffers on v7x too
        ),
        cost_estimate=cost,
    )(xr, prm)
    return out.reshape(N, C1, H, W)


def _reference(x, p1, p2, beta):
    # Pure-JAX replica of the PyTorch AconC forward (NCHW).
    dpx = (p1 - p2) * x
    return dpx * jax.nn.sigmoid(beta * dpx) + p2 * x


if __name__ == "__main__":
    N, C1, H, W = 2, 4, 16, 16

    key = jax.random.PRNGKey(0)
    k_x, k_p1, k_p2 = jax.random.split(key, 3)

    x = jax.random.normal(k_x, (N, C1, H, W), dtype=jnp.float32)
    # nn.Parameter(torch.randn(1, c1, 1, 1)) for p1/p2, torch.ones for beta.
    p1 = jax.random.normal(k_p1, (1, C1, 1, 1), dtype=jnp.float32)
    p2 = jax.random.normal(k_p2, (1, C1, 1, 1), dtype=jnp.float32)
    beta = jnp.ones((1, C1, 1, 1), dtype=jnp.float32)

    out = aconc(x, p1, p2, beta)
    out = jax.block_until_ready(out)

    ref = _reference(x, p1, p2, beta)
    assert out.shape == (N, C1, H, W)
    assert jnp.allclose(out, ref, atol=1e-5, rtol=1e-5), "mismatch vs reference"

    print("KERNEL_OK")
</pallas_src>

<mosaic_0001>
module attributes {stable_mosaic.version = 11 : i64} {
  func.func @_aconc_kernel(%arg0: i32, %arg1: i32, %arg2: memref<8x128xf32, #tpu.memory_space<vmem>>, %arg3: memref<8x3xf32, #tpu.memory_space<vmem>>, %arg4: memref<8x128xf32, #tpu.memory_space<vmem>>) attributes {dimension_semantics = [#tpu.dimension_semantics<parallel>, #tpu.dimension_semantics<parallel>], iteration_bounds = array<i64: 1, 2>, scalar_prefetch = 0 : i64, scratch_operands = 0 : i64, tpu.core_type = #tpu.core_type<tc>, window_params = [{transform_indices = @transform_0, window_bounds = array<i64: 8, 128>}, {transform_indices = @transform_1, window_bounds = array<i64: 8, 3>}, {transform_indices = @transform_2, window_bounds = array<i64: 8, 128>}]} {
    %c0 = arith.constant 0 : index
    %c0_0 = arith.constant 0 : index
    %0 = vector.load %arg2[%c0, %c0_0] : memref<8x128xf32, #tpu.memory_space<vmem>>, vector<8x128xf32>
    %c0_1 = arith.constant 0 : index
    %c0_2 = arith.constant 0 : index
    %1 = vector.load %arg3[%c0_1, %c0_2] : memref<8x3xf32, #tpu.memory_space<vmem>>, vector<8x1xf32>
    %c0_3 = arith.constant 0 : index
    %c1 = arith.constant 1 : index
    %2 = vector.load %arg3[%c0_3, %c1] : memref<8x3xf32, #tpu.memory_space<vmem>>, vector<8x1xf32>
    %c0_4 = arith.constant 0 : index
    %c2 = arith.constant 2 : index
    %3 = vector.load %arg3[%c0_4, %c2] : memref<8x3xf32, #tpu.memory_space<vmem>>, vector<8x1xf32>
    %4 = vector.broadcast %1 : vector<8x1xf32> to vector<8x128xf32>
    %5 = arith.mulf %4, %0 : vector<8x128xf32>
    %6 = math.tanh %5 : vector<8x128xf32>
    %7 = vector.broadcast %2 : vector<8x1xf32> to vector<8x128xf32>
    %8 = arith.mulf %7, %6 : vector<8x128xf32>
    %9 = vector.broadcast %3 : vector<8x1xf32> to vector<8x128xf32>
    %10 = arith.addf %8, %9 : vector<8x128xf32>
    %11 = arith.mulf %0, %10 : vector<8x128xf32>
    %c0_5 = arith.constant 0 : index
    %c0_6 = arith.constant 0 : index
    %12 = vector.load %arg4[%c0_5, %c0_6] : memref<8x128xf32, #tpu.memory_space<vmem>>, vector<8x128xf32>
    tpu.vector_store %arg4[%c0_5, %c0_6], %11 {strides = array<i32>} : memref<8x128xf32, #tpu.memory_space<vmem>>, vector<8x128xf32>,
    return
  }
  func.func @transform_0(%arg0: i32, %arg1: i32) -> (i32, i32) {
    %c0_i32 = arith.constant 0 : i32
    return %arg0, %arg1 : i32, i32
  }
  func.func @transform_1(%arg0: i32, %arg1: i32) -> (i32, i32) {
    %c0_i32 = arith.constant 0 : i32
    %c0_i32_0 = arith.constant 0 : i32
    return %arg0, %c0_i32 : i32, i32
  }
  func.func @transform_2(%arg0: i32, %arg1: i32) -> (i32, i32) {
    %c0_i32 = arith.constant 0 : i32
    return %arg0, %arg1 : i32, i32
  }
}

</mosaic_0001>

<bundles_post_ra>
// kernel: tpu_custom_call.1
= control target key start
LH: loop header
LB: loop body
LE: loop exit
PB: predicated region body
PF: predicated region fallthrough
CT: control target
= control target key end

     0   :  { %7 = vsyncpa [#allocation3], 0  ;;  %s722_s0 = inlined_call_operand.hbm [shape: f32[8,256], index: 0, kind: input, shape index: {}]   ;;  %s723_s1 = inlined_call_operand.vmem [shape: f32[8,3], index: 1, kind: input, shape index: {}]   ;;  %s724_s2 = inlined_call_operand.hbm [shape: f32[8,256], index: 2, kind: output, shape index: {}]  }
   0x1   :  { %9 = vsyncpa [#allocation3 + $0x1], 0 }
   0x2   :  { %10 = vsyncpa [#allocation4], 0 }
   0x3   :  { %12 = vsyncpa [#allocation4 + $0x1], 0  ;;  %s547_s9 = smov 0   ;;  %s549_s10 = smov 0  }
   0x4   :  { %s551_s11 = smov 0   ;;  %s553_s12 = smov 0  }
   0x5   :  { %s555_s13 = smov 0   ;;  %s557_s14 = smov 0  }
   0x6 LB: > { %s328_s15 = sadd.s32 4294967295, %s525_s14   ;;  %s329_s16 = sadd.s32 4294967294, %s525_s14   ;;  %s525_s14 = sphi %s557_s14, %s18_s14   ;;  %s521_s13 = sphi %s555_s13, %s740_s13   ;;  %s517_s12 = sphi %s553_s12, %s739_s12   ;;  %s513_s11 = sphi %s551_s11, %s738_s11   ;;  %s509_s10 = sphi %s549_s10, %s737_s10   ;;  %s505_s9 = sphi %s547_s9, %s736_s9  }
   0x7   : > { %s27_s17 = sadd.s32 1, %s521_s13  ;;  %s39_s18 = sadd.s32 1, %s513_s11 }
   0x8   : > { %p28_p0 = scmp.ge.s32.totalorder %s27_s17, 2  ;;  %p46_p1 = scmp.ne.s32.totalorder %s513_s11, %s509_s10 }
   0x9   : > { %p47_p2 = scmp.eq.s32.totalorder %s525_s14, 0  ;;  %p52_p3 = scmp.ne.s32.totalorder %s509_s10, %s505_s9 }
   0xa   : > { %s742_s17 = smov (%p28_p0, %s27_s17), 0  ;;  %p53_p5 = scmp.eq.s32.totalorder %s328_s15, 0 }
   0xb   : > { %p588_p4 = por %p47_p2, %p46_p1  ;;  %s35_s20 = ssub.s32 %s521_s13, %s742_s17 }
   0xc   : > { %p104_p6 = scmp.eq.s32.totalorder %s328_s15, 1  ;;  %p37_p7 = scmp.eq.s32.totalorder %s35_s20, 0 }
   0xd   : > { %p594_p8 = por %p53_p5, %p52_p3  ;;  %p110_p10 = scmp.eq.s32.totalorder %s329_s16, 1 }
   0xe   : > { %p598_p9 = por %p104_p6, %p46_p1  ;;  %p354_p13 = scmp.lt.s32.totalorder %s525_s14, 2 }
   0xf   : > { %s603_s23 = scalar_select %p37_p7, %s513_s11, %s39_s18  }
  0x10   : > { %s728_s22 = scalar_select %p598_p9, 1, 0 }
  0x11   : > { %p605_p11 = por %p110_p10, %p52_p3  ;;  %s137_s25 = sand.u32 1, %s513_s11  }
  0x12   : > { %s333_s26 = sshll.u32 %s137_s25, 3  ;;  %s334_s27 = sshll.u32 %s521_s13, 7 }
  0x13   : > { %s729_s24 = scalar_select %p605_p11, 1, 0 }
  0x14   : > { %s616_s30 = scalar_lea.hbm %s722_s0, %s334_s27  ;;  %s141_s3 = scalar_lea.vmem [#allocation2], %s333_s26 }
  0x15   : > { %s150_s4 = sshll.u32 %s141_s3, 4  ;;  %p622_p0 = pnand %p354_p13, %p588_p4  ;;  %s618_s4 = int_to_ptr.vmem [resolvable:$true] %s150_s4 }
  0x16   : > { %s138_s6 = scalar_lea.sflag [#allocation3], %s137_s25  ;;  %s413_s7 = scalar_lea.hbm %s616_s30, 128 }
  0x17   : > { %p414_p3 = scmp.ne.s32.totalorder %s616_s30, %s413_s7  ;;  %p415_p5 = pneg %p622_p0 }
  0x18   : > { %s418_s16 = scalar_lea.hbm %s722_s0, 256  ;;  %p419_p4 = scmp.lt.u32.totalorder %s616_s30, %s722_s0 }
  0x19   : > { %p416_p6 = pnand %p415_p5, %p414_p3  ;;  %p420_p10 = scmp.lt.u32.totalorder %s418_s16, %s413_s7 }
  0x1a   : > { %p422_p12 = scmp.lt.u32.totalorder %s413_s7, %s616_s30 }
  0x1b   : > { %p417_p7 = pneg %p416_p6  ;;  %p421_p13 = por %p420_p10, %p419_p4 }
  0x1d   : > { %p423_p1 = por %p422_p12, %p421_p13 }
  0x1f   : > { %p424_p2 = pnand %p423_p1, %p417_p7 }
  0x21   : > { %427 = shalt.err (!%p424_p2)
}
  0x22   : > { %s428_s20 = scalar_lea.vmem %s618_s4, 128  ;;  %s527_s25 = smov [#allocation2]  }
  0x23   : > { %p429_p3 = scmp.ne.s32.totalorder %s618_s4, %s428_s20  ;;  %s433_s26 = sshll.u32 %s527_s25, 4  ;;  %s434_s26 = int_to_ptr.vmem [resolvable:$false] %s433_s26 }
  0x24   : > { %s435_s27 = scalar_lea.vmem %s434_s26, 256  ;;  %p436_p9 = scmp.lt.s32.totalorder %s618_s4, %s434_s26 }
  0x25   : > { %p431_p6 = pnand %p429_p3, %p415_p5  ;;  %p437_p4 = scmp.lt.s32.totalorder %s435_s27, %s428_s20 }
  0x27   : > { %p432_p11 = pneg %p431_p6  ;;  %p438_p10 = por %p437_p4, %p436_p9 }
  0x29   : > { %p439_p12 = pnand %p438_p10, %p432_p11 }
  0x2b   : > { %442 = shalt.err (!%p439_p12)
}
  0x2c   : > { %349 = dma.hbm_to_vmem [thread:$0]  (!%p622_p0), %s616_s30, 128, %s618_s4, %s138_s6  }
  0x2d   : > { %p731_p1 = scmp.lt.s32.totalorder %s525_s14, 3  ;;  %p732_p2 = scmp.ge.s32.totalorder %s525_s14, 1 }
  0x2f   : > { %p156_p5 = pnand %p732_p2, %p731_p1 }
  0x30   : > { %s658_s28 = sand.u32 (!%p156_p5), 1, %s509_s10  }
  0x31   : > { %159 = sbr.rel (%p156_p5) target bundleno = 220 (0xdc), region = 28  ;;  %s336_s29 = sshll.u32 (!%p156_p5), %s658_s28, 3 }
  0x32   : > { %s162_s3 = scalar_lea.sflag (!%p156_p5), [#allocation3], %s658_s28  ;;  %s165_s7 = scalar_lea.vmem (!%p156_p5), [#allocation2], %s336_s29 }
  0x38   : > { %496 = dma.done.wait (%p594_p8), %s162_s3, 128  }
  0x39   : > { %498 = vsyncadd (%p594_p8), %s162_s3, 4294967168  ;;  %v528_v0 = vmov 0   ;;  %v529_v1 = vmov 2   ;;  %v195_v2 = vld [vmem:[%s723_s1] sm:$0xff]  ;;  %v530_v3 = vmov 1   ;;  %s339_s21 = sshll.u32 %s517_s12, 7 }
  0x3a   : > { %407 = vset.pattern.permute.xlu0 %v528_v0  ;;  %409 = vset.pattern.permute.xlu1 %v529_v1  ;;  %v194_v4 = vld [vmem:[%s165_s7] sm:$0xff]  ;;  %s189_s5 = scalar_lea.vmem [#allocation5], %s336_s29  ;;  %s673_s16 = scalar_lea.hbm %s724_s2, %s339_s21 }
  0x3b   : > { %198 = vperm.xlu0 %407, %v195_v2   ;;  %209 = vperm.xlu1 %409, %v195_v2   ;;  %s231_s6 = sshll.u32 %s189_s5, 4  ;;  %s216_s18 = scalar_lea.sflag [#allocation4], %s658_s28  ;;  %s675_s6 = int_to_ptr.vmem [resolvable:$true] %s231_s6 }
  0x3c   : > { %s443_s19 = scalar_lea.vmem %s675_s6, 128  ;;  %p733_p9 = scmp.ne.s32.totalorder %s728_s22, 0 }
  0x3d   : > { %p444_p8 = scmp.ne.s32.totalorder %s675_s6, %s443_s19  ;;  %s531_s12 = smov [#allocation5]  }
  0x3e   : > { %s447_s20 = sshll.u32 %s531_s12, 4  ;;  %s448_s20 = int_to_ptr.vmem [resolvable:$false] %s447_s20 }
  0x3f   : > { %408 = vset.pattern.permute.xlu0 %v530_v3  ;;  %p445_p11 = pnand %p444_p8, %p733_p9  ;;  %s449_s25 = scalar_lea.vmem %s448_s20, 256 }
  0x40   : > { %204 = vperm.xlu0 %408, %v195_v2   ;;  %p450_p7 = scmp.lt.s32.totalorder %s675_s6, %s448_s20  ;;  %p451_p13 = scmp.lt.s32.totalorder %s449_s25, %s443_s19 }
  0x41   : > { %p446_p0 = pneg %p445_p11 }
  0x42   : > { %p452_p3 = por %p451_p13, %p450_p7 }
  0x44   : > { %410 = vset.pattern.permute.xlu0 %v529_v1  ;;  %p453_p6 = pnand %p452_p3, %p446_p0 }
  0xba   : > { %v199_v5 = vpop.permute.xlu0 %198  ;;  %v210_v9 = vpop.permute.xlu1 %209 }
  0xbb   : > { %v201_v6 = vmul.f32 %v199_v5, %v194_v4 }
  0xbd   : > { %411 = vtanh.f32 %v201_v6 }
  0xbf   : > { %v205_v7 = vpop.permute.xlu0 %204 }
  0xc7   : > { %v412_v8 = vpop.eup %411 }
  0xc8   : > { %v207_v10 = vmul.f32 %v412_v8, %v205_v7 }
  0xca   : > { %v212_v11 = vadd.f32 %v210_v9, %v207_v10 }
  0xcc   : > { %v213_v12 = vmul.f32 %v212_v11, %v194_v4 }
  0xce   : > { %214 = vst [vmem:[%s189_s5] sm:$0xff] %v213_v12 }
  0xcf   : > { %456 = shalt.err (!%p453_p6)
}
  0xd0   : > { %s457_s26 = scalar_lea.hbm %s673_s16, 128  ;;  %s461_s29 = scalar_lea.hbm %s724_s2, 256 }
  0xd1   : > { %p458_p4 = scmp.ne.s32.totalorder %s673_s16, %s457_s26  ;;  %p462_p1 = scmp.lt.u32.totalorder %s673_s16, %s724_s2 }
  0xd2   : > { %p463_p2 = scmp.lt.u32.totalorder %s461_s29, %s457_s26  ;;  %p465_p8 = scmp.lt.u32.totalorder %s457_s26, %s673_s16 }
  0xd3   : > { %p459_p10 = pnand %p458_p4, %p733_p9 }
  0xd4   : > { %p464_p5 = por %p463_p2, %p462_p1 }
  0xd5   : > { %p460_p12 = pneg %p459_p10 }
  0xd6   : > { %p466_p11 = por %p465_p8, %p464_p5 }
  0xd8   : > { %p467_p0 = pnand %p466_p11, %p460_p12 }
  0xda   : > { %470 = shalt.err (!%p467_p0)
}
  0xdb   : > { %344 = dma.vmem_to_hbm [thread:$0]  (%p733_p9), %s675_s6, 128, %s673_s16, %s216_s18  }
  0xdc PF: > { %s243_s30 = sand.u32 1, %s505_s9   ;;  %p734_p7 = scmp.ne.s32.totalorder %s729_s24, 0 }
  0xdd   : > { %p735_p13 = scmp.ge.s32.totalorder %s525_s14, 2  ;;  %s244_s4 = scalar_lea.sflag [#allocation4], %s243_s30 }
  0xdf   : > { %p351_p3 = pnand %p735_p13, %p734_p7 }
  0xe1   : > { %500 = dma.done.wait (!%p351_p3), %s244_s4, 128  }
  0xe2   : > { %502 = vsyncadd (!%p351_p3), %s244_s4, 4294967168  ;;  %s18_s14 = sadd.s32 1, %s525_s14   ;;  %s736_s9 = smov %s509_s10 }
  0xe3   : > { %p15_p6 = scmp.ge.s32.totalorder %s18_s14, 4   ;;  %s737_s10 = smov %s513_s11 }
  0xe4   : > { %s738_s11 = smov %s603_s23  ;;  %s739_s12 = smov %s521_s13 }
  0xe5   : > { %s740_s13 = smov %s742_s17  ;;  %17 = sbr.rel (!%p15_p6) target bundleno = 6 (0x6), region = 76 }
  0xec   :  { %249 = vsyncpa [#allocation3], 1 }
  0xed   :  { %251 = vsyncpa [#allocation3 + $0x1], 1 }
  0xee   :  { %252 = vsyncpa [#allocation4], 1 }
  0xef   :  { %254 = vsyncpa [#allocation4 + $0x1], 1 }

</bundles_post_ra>
